<compile_context>
chip_gen: v6e
topology: v6e:2x2x1
jax: 0.10.0
libtpu: 0.0.40
codegen_flags: <defaults>
</compile_context>

<pallas_src>
import functools

import jax
import jax.numpy as jnp
from jax.experimental import pallas as pl
from jax.experimental.pallas import tpu as pltpu

IN = 1           # input width
HID = 120        # logical hidden width (PyTorch module: ls = 120)
HID_PAD = 128    # lane-padded hidden width used inside the kernel
OUT = 2          # output width


def _round_up(a, m):
    return -(-a // m) * m


def _choose_tile(n):
    """Pick (TM, n_pad).

    Small batches: a single full-size step (TM = padded N).
    Large batches: big multiple-of-256 tiles to amortize the ~0.35us/step grid
    overhead, but >=3-4 steps so both v7x TensorCores see work, and a 2048 cap
    so the lane-padded (TM,1) input block stays small in VMEM on v7x.
    """
    n8 = _round_up(n, 8)                       # sublane granularity
    if n8 <= 512:
        return n8, n8
    tm = min(2048, _round_up(-(-n8 // 4), 256))
    return tm, _round_up(n8, tm)


def _make_kernel(act_dtype):
    def mlp_kernel(x_ref,
                   w1_ref, b1_ref, w2_ref, b2_ref, w3_ref, b3_ref,
                   w4_ref, b4_ref, w5_ref, b5_ref, w6_ref, b6_ref,
                   o_ref):
        def sigmoid(z):
            # sigmoid(z) = 0.5*tanh(0.5*z) + 0.5  -> one EUP op (tanh);
            # the mul/adds land on the under-used VALU.
            half = jnp.asarray(0.5, z.dtype)
            return half * jnp.tanh(half * z) + half

        def dense(h, w_ref, b_ref):
            # bf16 MXU inputs, f32 accumulation, bias add in the bias dtype
            # (bf16 on v6e/v7x, f32 on older generations).
            z = jnp.dot(h.astype(w_ref.dtype), w_ref[...],
                        preferred_element_type=jnp.float32)
            return z.astype(b_ref.dtype) + b_ref[...]

        x = x_ref[...].astype(act_dtype)               # (TM, 1)
        # Layer 1: K=1 matmul is an outer product -> VPU broadcast multiply.
        h = sigmoid(x * w1_ref[...] + b1_ref[...])     # (TM, HID_PAD)
        h = sigmoid(dense(h, w2_ref, b2_ref))
        h = sigmoid(dense(h, w3_ref, b3_ref))
        h = sigmoid(dense(h, w4_ref, b4_ref))
        h = sigmoid(dense(h, w5_ref, b5_ref))
        # Final layer: f32 accumulate + f32 bias, store f32 (TM, 2).
        z = jnp.dot(h.astype(w6_ref.dtype), w6_ref[...],
                    preferred_element_type=jnp.float32)
        o_ref[...] = z + b6_ref[...]

    return mlp_kernel


def _resident_spec(shape):
    # Full-array block + constant index_map -> stays in VMEM, no per-step DMA.
    return pl.BlockSpec(shape, lambda i: (0, 0))


@functools.partial(jax.jit, static_argnames=("act_dtype",))
def network_forward(x, padded_params, act_dtype):
    """x: (N, 1) float32. padded_params: 6x (padded f32 W, padded f32 b).
    Returns (N, 2) float32."""
    n = x.shape[0]
    tm, n_pad = _choose_tile(n)
    if n_pad != n:
        x = jnp.pad(x, ((0, n_pad - n), (0, 0)))

    flat = []
    in_specs = [pl.BlockSpec((tm, 1), lambda i: (i, 0))]
    n_layers = len(padded_params)
    for li, (w, b) in enumerate(padded_params):
        if li == 0:                                   # VPU outer-product layer
            w, b = w.astype(act_dtype), b.astype(act_dtype)
        elif li < n_layers - 1:                       # hidden MXU layers
            w, b = w.astype(jnp.bfloat16), b.astype(act_dtype)
        else:                                         # final layer: f32 bias/out
            w = w.astype(jnp.bfloat16)
        in_specs += [_resident_spec(w.shape), _resident_spec(b.shape)]
        flat += [w, b]

    out = pl.pallas_call(
        _make_kernel(act_dtype),
        out_shape=jax.ShapeDtypeStruct((n_pad, OUT), jnp.float32),
        grid_spec=pltpu.PrefetchScalarGridSpec(
            num_scalar_prefetch=0,
            grid=(n_pad // tm,),
            in_specs=in_specs,
            out_specs=pl.BlockSpec((tm, OUT), lambda i: (i, 0)),
        ),
        compiler_params=pltpu.CompilerParams(
            dimension_semantics=("parallel",)),       # batch steps shard over v7x TCs
    )(x, *flat)
    return out[:n]


def _pick_act_dtype():
    """bf16 element-wise math only where the VALU/EUP support it (v6e / v7x)."""
    kind = jax.devices()[0].device_kind.lower()
    if ("v6" in kind) or ("v7" in kind) or ("7x" in kind):
        return jnp.bfloat16
    return jnp.float32


def init_params(key):
    """nn.Linear-style init: U(-1/sqrt(fan_in), 1/sqrt(fan_in)).

    Returns (ref_params, padded_params):
      ref_params    : unpadded f32 (in, out) weights / (out,) biases (PyTorch math)
      padded_params : lane-padded f32 weights (in_pad, out_pad) / biases (1, out_pad).
                      Padded rows AND columns are exactly zero, which is required
                      for the 120->128 padding to be mathematically inert.
    """
    dims = [(IN, HID)] + [(HID, HID)] * 4 + [(HID, OUT)]
    ref_params, padded_params = [], []
    for fan_in, fan_out in dims:
        key, kw, kb = jax.random.split(key, 3)
        bound = 1.0 / (float(fan_in) ** 0.5)
        w = jax.random.uniform(kw, (fan_in, fan_out), jnp.float32, -bound, bound)
        b = jax.random.uniform(kb, (fan_out,), jnp.float32, -bound, bound)
        ref_params.append((w, b))

        in_pad = HID_PAD if fan_in == HID else fan_in
        out_pad = HID_PAD if fan_out == HID else fan_out
        w_pad = jnp.zeros((in_pad, out_pad), jnp.float32).at[:fan_in, :fan_out].set(w)
        b_pad = jnp.zeros((1, out_pad), jnp.float32).at[0, :fan_out].set(b)
        # Padding-safety (per review): dead rows/cols must be zero so the padded
        # lanes (which carry sigmoid(0)=0.5 after activations) never leak.
        assert bool(jnp.all(w_pad[fan_in:, :] == 0.0))
        assert bool(jnp.all(w_pad[:, fan_out:] == 0.0))
        assert bool(jnp.all(b_pad[:, fan_out:] == 0.0))
        padded_params.append((w_pad, b_pad))
    return ref_params, padded_params


def reference_forward(x, params):
    """Pure-JAX f32 reference matching the PyTorch module exactly."""
    h = x
    for i, (w, b) in enumerate(params):
        h = h @ w + b
        if i < len(params) - 1:
            h = jax.nn.sigmoid(h)
    return h


if __name__ == "__main__":
    key = jax.random.PRNGKey(0)
    key, kx1, kx2 = jax.random.split(key, 3)

    ref_params, padded_params = init_params(key)
    act_dtype = _pick_act_dtype()

    # Small demo batch (time points t in [0,1)) -> single full-size grid step.
    x_small = jax.random.uniform(kx1, (8, 1), jnp.float32)
    out_small = jax.block_until_ready(network_forward(x_small, padded_params, act_dtype))
    ref_small = reference_forward(x_small, ref_params)
    assert out_small.shape == (8, OUT)
    # bf16 MXU inputs (+ bf16 element-wise on v6e/v7x) => loosened tolerance
    # vs. the exact f32 reference; f32 accumulation keeps the error small.
    assert jnp.allclose(out_small, ref_small, atol=3e-2, rtol=3e-2), "small-batch mismatch"

    # Larger batch to exercise the multi-step grid / tile-selection path.
    x_big = jax.random.uniform(kx2, (600, 1), jnp.float32)
    out_big = jax.block_until_ready(network_forward(x_big, padded_params, act_dtype))
    ref_big = reference_forward(x_big, ref_params)
    assert out_big.shape == (600, OUT)
    assert jnp.allclose(out_big, ref_big, atol=3e-2, rtol=3e-2), "multi-tile mismatch"

    print("KERNEL_OK")
</pallas_src>

<mosaic_0001>
module attributes {stable_mosaic.version = 11 : i64} {
  func.func @mlp_kernel(%arg0: i32, %arg1: memref<8x1xf32, #tpu.memory_space<vmem>>, %arg2: memref<1x128xf32, #tpu.memory_space<vmem>>, %arg3: memref<1x128xf32, #tpu.memory_space<vmem>>, %arg4: memref<128x128xbf16, #tpu.memory_space<vmem>>, %arg5: memref<1x128xf32, #tpu.memory_space<vmem>>, %arg6: memref<128x128xbf16, #tpu.memory_space<vmem>>, %arg7: memref<1x128xf32, #tpu.memory_space<vmem>>, %arg8: memref<128x128xbf16, #tpu.memory_space<vmem>>, %arg9: memref<1x128xf32, #tpu.memory_space<vmem>>, %arg10: memref<128x128xbf16, #tpu.memory_space<vmem>>, %arg11: memref<1x128xf32, #tpu.memory_space<vmem>>, %arg12: memref<128x2xbf16, #tpu.memory_space<vmem>>, %arg13: memref<1x2xf32, #tpu.memory_space<vmem>>, %arg14: memref<8x2xf32, #tpu.memory_space<vmem>>) attributes {dimension_semantics = [#tpu.dimension_semantics<parallel>], iteration_bounds = array<i64: 1>, scalar_prefetch = 0 : i64, scratch_operands = 0 : i64, tpu.core_type = #tpu.core_type<tc>, window_params = [{transform_indices = @transform_0, window_bounds = array<i64: 8, 1>}, {pipeline_mode = #tpu.pipeline_mode<synchronous>, transform_indices = @transform_1, window_bounds = array<i64: 1, 128>}, {pipeline_mode = #tpu.pipeline_mode<synchronous>, transform_indices = @transform_2, window_bounds = array<i64: 1, 128>}, {pipeline_mode = #tpu.pipeline_mode<synchronous>, transform_indices = @transform_3, window_bounds = array<i64: 128, 128>}, {pipeline_mode = #tpu.pipeline_mode<synchronous>, transform_indices = @transform_4, window_bounds = array<i64: 1, 128>}, {pipeline_mode = #tpu.pipeline_mode<synchronous>, transform_indices = @transform_5, window_bounds = array<i64: 128, 128>}, {pipeline_mode = #tpu.pipeline_mode<synchronous>, transform_indices = @transform_6, window_bounds = array<i64: 1, 128>}, {pipeline_mode = #tpu.pipeline_mode<synchronous>, transform_indices = @transform_7, window_bounds = array<i64: 128, 128>}, {pipeline_mode = #tpu.pipeline_mode<synchronous>, transform_indices = @transform_8, window_bounds = array<i64: 1, 128>}, {pipeline_mode = #tpu.pipeline_mode<synchronous>, transform_indices = @transform_9, window_bounds = array<i64: 128, 128>}, {pipeline_mode = #tpu.pipeline_mode<synchronous>, transform_indices = @transform_10, window_bounds = array<i64: 1, 128>}, {pipeline_mode = #tpu.pipeline_mode<synchronous>, transform_indices = @transform_11, window_bounds = array<i64: 128, 2>}, {pipeline_mode = #tpu.pipeline_mode<synchronous>, transform_indices = @transform_12, window_bounds = array<i64: 1, 2>}, {transform_indices = @transform_13, window_bounds = array<i64: 8, 2>}]} {
    %c0 = arith.constant 0 : index
    %c0_0 = arith.constant 0 : index
    %0 = vector.load %arg1[%c0, %c0_0] : memref<8x1xf32, #tpu.memory_space<vmem>>, vector<8x1xf32>
    %c0_1 = arith.constant 0 : index
    %c0_2 = arith.constant 0 : index
    %1 = vector.load %arg2[%c0_1, %c0_2] : memref<1x128xf32, #tpu.memory_space<vmem>>, vector<1x128xf32>
    %2 = vector.broadcast %0 : vector<8x1xf32> to vector<8x128xf32>
    %3 = vector.broadcast %1 : vector<1x128xf32> to vector<8x128xf32>
    %4 = arith.mulf %2, %3 : vector<8x128xf32>
    %c0_3 = arith.constant 0 : index
    %c0_4 = arith.constant 0 : index
    %5 = vector.load %arg3[%c0_3, %c0_4] : memref<1x128xf32, #tpu.memory_space<vmem>>, vector<1x128xf32>
    %6 = vector.broadcast %5 : vector<1x128xf32> to vector<8x128xf32>
    %7 = arith.addf %4, %6 : vector<8x128xf32>
    %cst = arith.constant 5.000000e-01 : f32
    %8 = vector.broadcast %cst : f32 to vector<8x128xf32>
    %9 = arith.mulf %8, %7 : vector<8x128xf32>
    %10 = math.tanh %9 : vector<8x128xf32>
    %cst_5 = arith.constant 5.000000e-01 : f32
    %11 = vector.broadcast %cst_5 : f32 to vector<8x128xf32>
    %12 = arith.mulf %11, %10 : vector<8x128xf32>
    %cst_6 = arith.constant 5.000000e-01 : f32
    %13 = vector.broadcast %cst_6 : f32 to vector<8x128xf32>
    %14 = arith.addf %12, %13 : vector<8x128xf32>
    %15 = arith.truncf %14 : vector<8x128xf32> to vector<8x128xbf16>
    %c0_7 = arith.constant 0 : index
    %c0_8 = arith.constant 0 : index
    %16 = vector.load %arg4[%c0_7, %c0_8] : memref<128x128xbf16, #tpu.memory_space<vmem>>, vector<128x128xbf16>
    %cst_9 = arith.constant dense<0.000000e+00> : vector<8x128xf32>
    %17 = tpu.matmul %15, %16, %cst_9 {dimension_numbers = #tpu.dot_dimension_numbers<[1], [0], [0], [1], [0, 0, 1, 1], [], []>} : vector<8x128xbf16>, vector<128x128xbf16>, vector<8x128xf32> -> vector<8x128xf32>
    %c0_10 = arith.constant 0 : index
    %c0_11 = arith.constant 0 : index
    %18 = vector.load %arg5[%c0_10, %c0_11] : memref<1x128xf32, #tpu.memory_space<vmem>>, vector<1x128xf32>
    %19 = vector.broadcast %18 : vector<1x128xf32> to vector<8x128xf32>
    %20 = arith.addf %17, %19 : vector<8x128xf32>
    %cst_12 = arith.constant 5.000000e-01 : f32
    %21 = vector.broadcast %cst_12 : f32 to vector<8x128xf32>
    %22 = arith.mulf %21, %20 : vector<8x128xf32>
    %23 = math.tanh %22 : vector<8x128xf32>
    %cst_13 = arith.constant 5.000000e-01 : f32
    %24 = vector.broadcast %cst_13 : f32 to vector<8x128xf32>
    %25 = arith.mulf %24, %23 : vector<8x128xf32>
    %cst_14 = arith.constant 5.000000e-01 : f32
    %26 = vector.broadcast %cst_14 : f32 to vector<8x128xf32>
    %27 = arith.addf %25, %26 : vector<8x128xf32>
    %28 = arith.truncf %27 : vector<8x128xf32> to vector<8x128xbf16>
    %c0_15 = arith.constant 0 : index
    %c0_16 = arith.constant 0 : index
    %29 = vector.load %arg6[%c0_15, %c0_16] : memref<128x128xbf16, #tpu.memory_space<vmem>>, vector<128x128xbf16>
    %cst_17 = arith.constant dense<0.000000e+00> : vector<8x128xf32>
    %30 = tpu.matmul %28, %29, %cst_17 {dimension_numbers = #tpu.dot_dimension_numbers<[1], [0], [0], [1], [0, 0, 1, 1], [], []>} : vector<8x128xbf16>, vector<128x128xbf16>, vector<8x128xf32> -> vector<8x128xf32>
    %c0_18 = arith.constant 0 : index
    %c0_19 = arith.constant 0 : index
    %31 = vector.load %arg7[%c0_18, %c0_19] : memref<1x128xf32, #tpu.memory_space<vmem>>, vector<1x128xf32>
    %32 = vector.broadcast %31 : vector<1x128xf32> to vector<8x128xf32>
    %33 = arith.addf %30, %32 : vector<8x128xf32>
    %cst_20 = arith.constant 5.000000e-01 : f32
    %34 = vector.broadcast %cst_20 : f32 to vector<8x128xf32>
    %35 = arith.mulf %34, %33 : vector<8x128xf32>
    %36 = math.tanh %35 : vector<8x128xf32>
    %cst_21 = arith.constant 5.000000e-01 : f32
    %37 = vector.broadcast %cst_21 : f32 to vector<8x128xf32>
    %38 = arith.mulf %37, %36 : vector<8x128xf32>
    %cst_22 = arith.constant 5.000000e-01 : f32
    %39 = vector.broadcast %cst_22 : f32 to vector<8x128xf32>
    %40 = arith.addf %38, %39 : vector<8x128xf32>
    %41 = arith.truncf %40 : vector<8x128xf32> to vector<8x128xbf16>
    %c0_23 = arith.constant 0 : index
    %c0_24 = arith.constant 0 : index
    %42 = vector.load %arg8[%c0_23, %c0_24] : memref<128x128xbf16, #tpu.memory_space<vmem>>, vector<128x128xbf16>
    %cst_25 = arith.constant dense<0.000000e+00> : vector<8x128xf32>
    %43 = tpu.matmul %41, %42, %cst_25 {dimension_numbers = #tpu.dot_dimension_numbers<[1], [0], [0], [1], [0, 0, 1, 1], [], []>} : vector<8x128xbf16>, vector<128x128xbf16>, vector<8x128xf32> -> vector<8x128xf32>
    %c0_26 = arith.constant 0 : index
    %c0_27 = arith.constant 0 : index
    %44 = vector.load %arg9[%c0_26, %c0_27] : memref<1x128xf32, #tpu.memory_space<vmem>>, vector<1x128xf32>
    %45 = vector.broadcast %44 : vector<1x128xf32> to vector<8x128xf32>
    %46 = arith.addf %43, %45 : vector<8x128xf32>
    %cst_28 = arith.constant 5.000000e-01 : f32
    %47 = vector.broadcast %cst_28 : f32 to vector<8x128xf32>
    %48 = arith.mulf %47, %46 : vector<8x128xf32>
    %49 = math.tanh %48 : vector<8x128xf32>
    %cst_29 = arith.constant 5.000000e-01 : f32
    %50 = vector.broadcast %cst_29 : f32 to vector<8x128xf32>
    %51 = arith.mulf %50, %49 : vector<8x128xf32>
    %cst_30 = arith.constant 5.000000e-01 : f32
    %52 = vector.broadcast %cst_30 : f32 to vector<8x128xf32>
    %53 = arith.addf %51, %52 : vector<8x128xf32>
    %54 = arith.truncf %53 : vector<8x128xf32> to vector<8x128xbf16>
    %c0_31 = arith.constant 0 : index
    %c0_32 = arith.constant 0 : index
    %55 = vector.load %arg10[%c0_31, %c0_32] : memref<128x128xbf16, #tpu.memory_space<vmem>>, vector<128x128xbf16>
    %cst_33 = arith.constant dense<0.000000e+00> : vector<8x128xf32>
    %56 = tpu.matmul %54, %55, %cst_33 {dimension_numbers = #tpu.dot_dimension_numbers<[1], [0], [0], [1], [0, 0, 1, 1], [], []>} : vector<8x128xbf16>, vector<128x128xbf16>, vector<8x128xf32> -> vector<8x128xf32>
    %c0_34 = arith.constant 0 : index
    %c0_35 = arith.constant 0 : index
    %57 = vector.load %arg11[%c0_34, %c0_35] : memref<1x128xf32, #tpu.memory_space<vmem>>, vector<1x128xf32>
    %58 = vector.broadcast %57 : vector<1x128xf32> to vector<8x128xf32>
    %59 = arith.addf %56, %58 : vector<8x128xf32>
    %cst_36 = arith.constant 5.000000e-01 : f32
    %60 = vector.broadcast %cst_36 : f32 to vector<8x128xf32>
    %61 = arith.mulf %60, %59 : vector<8x128xf32>
    %62 = math.tanh %61 : vector<8x128xf32>
    %cst_37 = arith.constant 5.000000e-01 : f32
    %63 = vector.broadcast %cst_37 : f32 to vector<8x128xf32>
    %64 = arith.mulf %63, %62 : vector<8x128xf32>
    %cst_38 = arith.constant 5.000000e-01 : f32
    %65 = vector.broadcast %cst_38 : f32 to vector<8x128xf32>
    %66 = arith.addf %64, %65 : vector<8x128xf32>
    %67 = arith.truncf %66 : vector<8x128xf32> to vector<8x128xbf16>
    %c0_39 = arith.constant 0 : index
    %c0_40 = arith.constant 0 : index
    %68 = vector.load %arg12[%c0_39, %c0_40] : memref<128x2xbf16, #tpu.memory_space<vmem>>, vector<128x2xbf16>
    %cst_41 = arith.constant dense<0.000000e+00> : vector<8x2xf32>
    %69 = tpu.matmul %67, %68, %cst_41 {dimension_numbers = #tpu.dot_dimension_numbers<[1], [0], [0], [1], [0, 0, 1, 1], [], []>} : vector<8x128xbf16>, vector<128x2xbf16>, vector<8x2xf32> -> vector<8x2xf32>
    %c0_42 = arith.constant 0 : index
    %c0_43 = arith.constant 0 : index
    %70 = vector.load %arg13[%c0_42, %c0_43] : memref<1x2xf32, #tpu.memory_space<vmem>>, vector<1x2xf32>
    %71 = vector.broadcast %70 : vector<1x2xf32> to vector<8x2xf32>
    %72 = arith.addf %69, %71 : vector<8x2xf32>
    %c0_44 = arith.constant 0 : index
    %c0_45 = arith.constant 0 : index
    %73 = vector.load %arg14[%c0_44, %c0_45] : memref<8x2xf32, #tpu.memory_space<vmem>>, vector<8x2xf32>
    tpu.vector_store %arg14[%c0_44, %c0_45], %72 {strides = array<i32>} : memref<8x2xf32, #tpu.memory_space<vmem>>, vector<8x2xf32>,
    return
  }
  func.func @transform_0(%arg0: i32) -> (i32, i32) {
    %c0_i32 = arith.constant 0 : i32
    %c0_i32_0 = arith.constant 0 : i32
    return %arg0, %c0_i32 : i32, i32
  }
  func.func @transform_1(%arg0: i32) -> (i32, i32) {
    %c0_i32 = arith.constant 0 : i32
    %c0_i32_0 = arith.constant 0 : i32
    %c0_i32_1 = arith.constant 0 : i32
    return %c0_i32, %c0_i32_0 : i32, i32
  }
  func.func @transform_2(%arg0: i32) -> (i32, i32) {
    %c0_i32 = arith.constant 0 : i32
    %c0_i32_0 = arith.constant 0 : i32
    %c0_i32_1 = arith.constant 0 : i32
    return %c0_i32, %c0_i32_0 : i32, i32
  }
  func.func @transform_3(%arg0: i32) -> (i32, i32) {
    %c0_i32 = arith.constant 0 : i32
    %c0_i32_0 = arith.constant 0 : i32
    %c0_i32_1 = arith.constant 0 : i32
    return %c0_i32, %c0_i32_0 : i32, i32
  }
  func.func @transform_4(%arg0: i32) -> (i32, i32) {
    %c0_i32 = arith.constant 0 : i32
    %c0_i32_0 = arith.constant 0 : i32
    %c0_i32_1 = arith.constant 0 : i32
    return %c0_i32, %c0_i32_0 : i32, i32
  }
  func.func @transform_5(%arg0: i32) -> (i32, i32) {
    %c0_i32 = arith.constant 0 : i32
    %c0_i32_0 = arith.constant 0 : i32
    %c0_i32_1 = arith.constant 0 : i32
    return %c0_i32, %c0_i32_0 : i32, i32
  }
  func.func @transform_6(%arg0: i32) -> (i32, i32) {
    %c0_i32 = arith.constant 0 : i32
    %c0_i32_0 = arith.constant 0 : i32
    %c0_i32_1 = arith.constant 0 : i32
    return %c0_i32, %c0_i32_0 : i32, i32
  }
  func.func @transform_7(%arg0: i32) -> (i32, i32) {
    %c0_i32 = arith.constant 0 : i32
    %c0_i32_0 = arith.constant 0 : i32
    %c0_i32_1 = arith.constant 0 : i32
    return %c0_i32, %c0_i32_0 : i32, i32
  }
  func.func @transform_8(%arg0: i32) -> (i32, i32) {
    %c0_i32 = arith.constant 0 : i32
    %c0_i32_0 = arith.constant 0 : i32
    %c0_i32_1 = arith.constant 0 : i32
    return %c0_i32, %c0_i32_0 : i32, i32
  }
  func.func @transform_9(%arg0: i32) -> (i32, i32) {
    %c0_i32 = arith.constant 0 : i32
    %c0_i32_0 = arith.constant 0 : i32
    %c0_i32_1 = arith.constant 0 : i32
    return %c0_i32, %c0_i32_0 : i32, i32
  }
  func.func @transform_10(%arg0: i32) -> (i32, i32) {
    %c0_i32 = arith.constant 0 : i32
    %c0_i32_0 = arith.constant 0 : i32
    %c0_i32_1 = arith.constant 0 : i32
    return %c0_i32, %c0_i32_0 : i32, i32
  }
  func.func @transform_11(%arg0: i32) -> (i32, i32) {
    %c0_i32 = arith.constant 0 : i32
    %c0_i32_0 = arith.constant 0 : i32
    %c0_i32_1 = arith.constant 0 : i32
    return %c0_i32, %c0_i32_0 : i32, i32
  }
  func.func @transform_12(%arg0: i32) -> (i32, i32) {
    %c0_i32 = arith.constant 0 : i32
    %c0_i32_0 = arith.constant 0 : i32
    %c0_i32_1 = arith.constant 0 : i32
    return %c0_i32, %c0_i32_0 : i32, i32
  }
  func.func @transform_13(%arg0: i32) -> (i32, i32) {
    %c0_i32 = arith.constant 0 : i32
    %c0_i32_0 = arith.constant 0 : i32
    return %arg0, %c0_i32 : i32, i32
  }
}

</mosaic_0001>

<bundles_post_ra>
// kernel: network_forward.1
= control target key start
LH: loop header
LB: loop body
LE: loop exit
PB: predicated region body
PF: predicated region fallthrough
CT: control target
= control target key end

     0   :  { %v899_v0 = vmov 0   ;;  %v900_v2 = vmov 0.0   ;;  %vm901_vm0 = vmmov 0   ;;  %vm647_vm1 = vcmask 15360   ;;  %s1169_s0 = inlined_call_operand.vmem [shape: f32[8,1], index: 0, kind: input, shape index: {}]   ;;  %s1170_s3 = inlined_call_operand.vmem [shape: bf16[128,128], index: 3, kind: input, shape index: {}]   ;;  %s1171_s5 = inlined_call_operand.vmem [shape: bf16[128,128], index: 5, kind: input, shape index: {}]   ;;  %s1172_s1 = inlined_call_operand.vmem [shape: f32[1,128], index: 1, kind: input, shape index: {}]   ;;  %s1173_s2 = inlined_call_operand.vmem [shape: f32[1,128], index: 2, kind: input, shape index: {}]   ;;  %s1174_s7 = inlined_call_operand.vmem [shape: bf16[128,128], index: 7, kind: input, shape index: {}]   ;;  %s1175_s4 = inlined_call_operand.vmem [shape: f32[1,128], index: 4, kind: input, shape index: {}]   ;;  %s1176_s9 = inlined_call_operand.vmem [shape: bf16[128,128], index: 9, kind: input, shape index: {}]   ;;  %s1177_s6 = inlined_call_operand.vmem [shape: f32[1,128], index: 6, kind: input, shape index: {}]   ;;  %s1178_s11 = inlined_call_operand.vmem [shape: bf16[128,2], index: 11, kind: input, shape index: {}]   ;;  %s1179_s8 = inlined_call_operand.vmem [shape: f32[1,128], index: 8, kind: input, shape index: {}]   ;;  %s1180_s10 = inlined_call_operand.vmem [shape: f32[1,128], index: 10, kind: input, shape index: {}]   ;;  %s1181_s12 = inlined_call_operand.vmem [shape: f32[1,2], index: 12, kind: input, shape index: {}]   ;;  %s1182_s13 = inlined_call_operand.vmem [shape: f32[8,2], index: 13, kind: output, shape index: {}]  }
   0x1   :  { %848 = vset.pattern.permute.xlu0 %v899_v0  ;;  %v45_v1 = vld [vmem:[%s1169_s0] sm:$0xff]  ;;  %745 = vmatprep.subr.bf16.mxu0 %v900_v2  ;;  %v849_v3 = vld [vmem:[%s1170_s3 + $0x38] sm:$0xff]   ;;  %v850_v4 = vld [vmem:[%s1170_s3 + $0x30] sm:$0xff]  }
   0x2   :  { %49 = vperm.xlu0 %848, %v45_v1   ;;  %765 = vmatprep.subr.bf16.mxu1 %v900_v2  ;;  %v851_v5 = vld [vmem:[%s1170_s3 + $0x28] sm:$0xff]   ;;  %v852_v6 = vld [vmem:[%s1170_s3 + $0x20] sm:$0xff]   ;;  %v853_v7 = vld [vmem:[%s1170_s3 + $0x18] sm:$0xff]  }
   0x3   :  { %746 = vmatpush3.bf16.msra.mxu0 %v849_v3  ;;  %761 = vmatprep.mubr.msk.bf16.mxu0 %vm901_vm0, %v900_v2  ;;  %v854_v8 = vld [vmem:[%s1170_s3 + $0x10] sm:$0xff]   ;;  %v855_v9 = vld [vmem:[%s1170_s3 + $0x8] sm:$0xff]   ;;  %v857_v10 = vld [vmem:[%s1171_s5 + $0x38] sm:$0xff]  }
   0x4   :  { %747 = vmatprep.subr.bf16.mxu0 %v900_v2  ;;  %781 = vmatprep.mubr.msk.bf16.mxu1 %vm901_vm0, %v900_v2  ;;  %v856_v11 = vld [vmem:[%s1170_s3] sm:$0xff]   ;;  %v858_v12 = vld [vmem:[%s1171_s5 + $0x30] sm:$0xff]   ;;  %v859_v23 = vld [vmem:[%s1171_s5 + $0x28] sm:$0xff]  }
   0x5   :  { %766 = vmatpush3.bf16.msra.mxu1 %v857_v10  ;;  %v653_v13 = vld [vmem:[%s1172_s1] ss:$0 sm:$0xff]  ;;  %v861_v25 = vld [vmem:[%s1171_s5 + $0x18] sm:$0xff]   ;;  %v862_v26 = vld [vmem:[%s1171_s5 + $0x10] sm:$0xff]  }
   0x6   :  { %767 = vmatprep.subr.bf16.mxu1 %v900_v2  ;;  %v654_v14 = vld [vmem:[%s1173_s2] ss:$0 sm:$0xff]  ;;  %v863_v27 = vld [vmem:[%s1171_s5 + $0x8] sm:$0xff]   ;;  %v865_v29 = vld [vmem:[%s1174_s7 + $0x38] sm:$0xff]  }
   0x7   :  { %748 = vmatpush3.bf16.msra.mxu0 %v850_v4  ;;  %v860_v24 = vld [vmem:[%s1171_s5 + $0x20] sm:$0xff]   ;;  %v866_v30 = vld [vmem:[%s1174_s7 + $0x30] sm:$0xff]   ;;  %v867_v42 = vld [vmem:[%s1174_s7 + $0x28] sm:$0xff]  }
   0x8   :  { %749 = vmatprep.subr.bf16.mxu0 %v900_v2  ;;  %v864_v28 = vld [vmem:[%s1171_s5] sm:$0xff]   ;;  %v869_v44 = vld [vmem:[%s1174_s7 + $0x18] sm:$0xff]   ;;  %v870_v45 = vld [vmem:[%s1174_s7 + $0x10] sm:$0xff]  }
   0x9   :  { %768 = vmatpush3.bf16.msra.mxu1 %v858_v12  ;;  %v655_v31 = vld [vmem:[%s1175_s4] ss:$0 sm:$0xff]  ;;  %v871_v46 = vld [vmem:[%s1174_s7 + $0x8] sm:$0xff]   ;;  %v873_v48 = vld [vmem:[%s1176_s9 + $0x38] sm:$0xff]  }
   0xa   :  { %769 = vmatprep.subr.bf16.mxu1 %v900_v2  ;;  %v868_v43 = vld [vmem:[%s1174_s7 + $0x20] sm:$0xff]   ;;  %v874_v49 = vld [vmem:[%s1176_s9 + $0x30] sm:$0xff]   ;;  %v875_v61 = vld [vmem:[%s1176_s9 + $0x28] sm:$0xff]  }
   0xb   :  { %750 = vmatpush3.bf16.msra.mxu0 %v851_v5  ;;  %v872_v47 = vld [vmem:[%s1174_s7] sm:$0xff]   ;;  %v877_v63 = vld [vmem:[%s1176_s9 + $0x18] sm:$0xff]   ;;  %v878_v0 = vld [vmem:[%s1176_s9 + $0x10] sm:$0xff]  }
   0xc   :  { %751 = vmatprep.subr.bf16.mxu0 %v900_v2  ;;  %v664_v50 = vld [vmem:[%s1177_s6] ss:$0 sm:$0xff]  ;;  %v879_v1 = vld [vmem:[%s1176_s9 + $0x8] sm:$0xff]   ;;  %v881_v4 = vld [vmem:[%s1178_s11 + $0x38] sm:$0xff]  }
   0xd   :  { %770 = vmatpush3.bf16.msra.mxu1 %v859_v23  ;;  %v876_v62 = vld [vmem:[%s1176_s9 + $0x20] sm:$0xff]   ;;  %v882_v5 = vld [vmem:[%s1178_s11 + $0x30] sm:$0xff]  }
   0xe   :  { %771 = vmatprep.subr.bf16.mxu1 %v900_v2  ;;  %v880_v3 = vld [vmem:[%s1176_s9] sm:$0xff]  }
   0xf   :  { %752 = vmatpush3.bf16.msra.mxu0 %v852_v6  ;;  %v673_v6 = vld [vmem:[%s1179_s8] ss:$0 sm:$0xff] }
  0x10   :  { %753 = vmatprep.subr.bf16.mxu0 %v900_v2  ;;  %v682_v23 = vld [vmem:[%s1180_s10] ss:$0 sm:$0xff] }
  0x11   :  { %772 = vmatpush3.bf16.msra.mxu1 %v860_v24 }
  0x12   :  { %773 = vmatprep.subr.bf16.mxu1 %v900_v2 }
  0x13   :  { %754 = vmatpush3.bf16.msra.mxu0 %v853_v7 }
  0x14   :  { %755 = vmatprep.subr.bf16.mxu0 %v900_v2 }
  0x15   :  { %774 = vmatpush3.bf16.msra.mxu1 %v861_v25 }
  0x16   :  { %775 = vmatprep.subr.bf16.mxu1 %v900_v2 }
  0x17   :  { %756 = vmatpush3.bf16.msra.mxu0 %v854_v8 }
  0x18   :  { %757 = vmatprep.subr.bf16.mxu0 %v900_v2 }
  0x19   :  { %776 = vmatpush3.bf16.msra.mxu1 %v862_v26 }
  0x1a   :  { %777 = vmatprep.subr.bf16.mxu1 %v900_v2 }
  0x1b   :  { %758 = vmatpush3.bf16.msra.mxu0 %v855_v9 }
  0x1c   :  { %759 = vmatprep.subr.bf16.mxu0 %v900_v2 }
  0x1d   :  { %778 = vmatpush3.bf16.msra.mxu1 %v863_v27 }
  0x1e   :  { %779 = vmatprep.subr.bf16.mxu1 %v900_v2 }
  0x1f   :  { %760 = vmatpush3.bf16.msra.mxu0 %v856_v11 }
  0x20   :  { %785 = vmatprep.subr.bf16.mxu0 %v900_v2 }
  0x21   :  { %780 = vmatpush3.bf16.msra.mxu1 %v864_v28 }
  0x22   :  { %805 = vmatprep.subr.bf16.mxu1 %v900_v2 }
  0x7d   :  { %v50_v15 = vpop.permute.xlu0 %49 }
  0x7e   :  { %v58_v16 = vmul.f32 %v653_v13, %v50_v15 }
  0x80   :  { %v66_v17 = vadd.f32 %v654_v14, %v58_v16 }
  0x82   :  { %v67_v18 = vmul.f32 0.5, %v66_v17  ;;  %v883_v17 = vld [vmem:[%s1178_s11 + $0x28] sm:$0xff]  }
  0x84   :  { %889 = vtanh.f32 %v67_v18  ;;  %v884_v18 = vld [vmem:[%s1178_s11 + $0x20] sm:$0xff]  }
  0x91   :  { %v890_v19 = vpop.eup %889 }
  0x92   :  { %v69_v20 = vmul.f32 0.5, %v890_v19  ;;  %v885_v19 = vld [vmem:[%s1178_s11 + $0x18] sm:$0xff]  }
  0x94   :  { %v70_v21 = vadd.f32 0.5, %v69_v20  ;;  %v886_v20 = vld [vmem:[%s1178_s11 + $0x10] sm:$0xff]  }
  0x96   :  { %v71_v22 = vpack.c.bf16 %v70_v21, %v70_v21  ;;  %v887_v21 = vld [vmem:[%s1178_s11 + $0x8] sm:$0xff]  }
  0x98   :  { %762 = vmatmul.mubr.bf16.vlgmr.msra.gmra.mxu0 %v71_v22  ;;  %v888_v22 = vld [vmem:[%s1178_s11] sm:$0xff]  }
  0x99   :  { %801 = vmatprep.mubr.msk.bf16.mxu0 %vm901_vm0, %v900_v2  ;;  %786 = vmatpush3.bf16.msra.mxu0 %v865_v29 }
  0x9a   :  { %787 = vmatprep.subr.bf16.mxu0 %v900_v2 }
  0x9d   :  { %788 = vmatpush3.bf16.msra.mxu0 %v866_v30 }
  0x9e   :  { %789 = vmatprep.subr.bf16.mxu0 %v900_v2 }
  0xa1   :  { %790 = vmatpush3.bf16.msra.mxu0 %v867_v42 }
  0xa2   :  { %791 = vmatprep.subr.bf16.mxu0 %v900_v2 }
  0xa5   :  { %792 = vmatpush3.bf16.msra.mxu0 %v868_v43 }
  0xa6   :  { %793 = vmatprep.subr.bf16.mxu0 %v900_v2 }
  0xa9   :  { %794 = vmatpush3.bf16.msra.mxu0 %v869_v44 }
  0xaa   :  { %795 = vmatprep.subr.bf16.mxu0 %v900_v2 }
  0xad   :  { %796 = vmatpush3.bf16.msra.mxu0 %v870_v45 }
  0xae   :  { %797 = vmatprep.subr.bf16.mxu0 %v900_v2 }
  0xb1   :  { %798 = vmatpush3.bf16.msra.mxu0 %v871_v46 }
  0xb2   :  { %799 = vmatprep.subr.bf16.mxu0 %v900_v2 }
  0xb5   :  { %800 = vmatpush3.bf16.msra.mxu0 %v872_v47 }
  0xb6   :  { %825 = vmatprep.subr.bf16.mxu0 %v900_v2 }
 0x158   :  { %v177_v32 = vpop.f32.mrf.mxu0 }
 0x159   :  { %v178_v33 = vadd.f32 %v655_v31, %v177_v32 }
 0x15a   :  { %v763_v34 = vpop.f32.mrf.mxu0 }
 0x15b   :  { %v183_v35 = vmul.f32 0.5, %v178_v33  ;;  %v691_v33 = vld [vmem:[%s1181_s12] ss:$0 sm:$0xff] }
 0x15c   :  { %v180_v36 = vpop.f32.mrf.mxu0 }
 0x15d   :  { %891 = vtanh.f32 %v183_v35 }
 0x15e   :  { %v764_v37 = vpop.f32.mrf.mxu0 }
 0x16a   :  { %v892_v38 = vpop.eup %891 }
 0x16b   :  { %v185_v39 = vmul.f32 0.5, %v892_v38 }
 0x16d   :  { %v186_v40 = vadd.f32 0.5, %v185_v39 }
 0x16f   :  { %v187_v41 = vpack.c.bf16 %v186_v40, %v186_v40 }
 0x171   :  { %782 = vmatmul.mubr.bf16.vlgmr.msra.gmra.mxu1 %v187_v41 }
 0x172   :  { %821 = vmatprep.mubr.msk.bf16.mxu1 %vm901_vm0, %v900_v2  ;;  %806 = vmatpush3.bf16.msra.mxu1 %v873_v48 }
 0x173   :  { %807 = vmatprep.subr.bf16.mxu1 %v900_v2 }
 0x176   :  { %808 = vmatpush3.bf16.msra.mxu1 %v874_v49 }
 0x177   :  { %809 = vmatprep.subr.bf16.mxu1 %v900_v2 }
 0x17a   :  { %810 = vmatpush3.bf16.msra.mxu1 %v875_v61 }
 0x17b   :  { %811 = vmatprep.subr.bf16.mxu1 %v900_v2 }
 0x17e   :  { %812 = vmatpush3.bf16.msra.mxu1 %v876_v62 }
 0x17f   :  { %813 = vmatprep.subr.bf16.mxu1 %v900_v2 }
 0x182   :  { %814 = vmatpush3.bf16.msra.mxu1 %v877_v63 }
 0x183   :  { %815 = vmatprep.subr.bf16.mxu1 %v900_v2 }
 0x186   :  { %816 = vmatpush3.bf16.msra.mxu1 %v878_v0 }
 0x187   :  { %817 = vmatprep.subr.bf16.mxu1 %v900_v2 }
 0x18a   :  { %818 = vmatpush3.bf16.msra.mxu1 %v879_v1 }
 0x18b   :  { %819 = vmatprep.subr.bf16.mxu1 %v900_v2 }
 0x18e   :  { %820 = vmatpush3.bf16.msra.mxu1 %v880_v3 }
 0x231   :  { %v293_v51 = vpop.f32.mrf.mxu1 }
 0x232   :  { %v294_v52 = vadd.f32 %v664_v50, %v293_v51 }
 0x233   :  { %v783_v53 = vpop.f32.mrf.mxu1 }
 0x234   :  { %v299_v54 = vmul.f32 0.5, %v294_v52 }
 0x235   :  { %v296_v55 = vpop.f32.mrf.mxu1 }
 0x236   :  { %893 = vtanh.f32 %v299_v54 }
 0x237   :  { %v784_v56 = vpop.f32.mrf.mxu1 }
 0x243   :  { %v894_v57 = vpop.eup %893 }
 0x244   :  { %v301_v58 = vmul.f32 0.5, %v894_v57 }
 0x246   :  { %v302_v59 = vadd.f32 0.5, %v301_v58 }
 0x248   :  { %v303_v60 = vpack.c.bf16 %v302_v59, %v302_v59 }
 0x24a   :  { %802 = vmatmul.mubr.bf16.vlgmr.msra.gmra.mxu0 %v303_v60 }
 0x24b   :  { %841 = vmatprep.mubr.msk.bf16.mxu0 %vm901_vm0, %v900_v2  ;;  %826 = vmatpush3.bf16.msra.mxu0 %v881_v4 }
 0x24c   :  { %827 = vmatprep.subr.bf16.mxu0 %v900_v2 }
 0x24f   :  { %828 = vmatpush3.bf16.msra.mxu0 %v882_v5 }
 0x250   :  { %829 = vmatprep.subr.bf16.mxu0 %v900_v2 }
 0x253   :  { %830 = vmatpush3.bf16.msra.mxu0 %v883_v17 }
 0x254   :  { %831 = vmatprep.subr.bf16.mxu0 %v900_v2 }
 0x257   :  { %832 = vmatpush3.bf16.msra.mxu0 %v884_v18 }
 0x258   :  { %833 = vmatprep.subr.bf16.mxu0 %v900_v2 }
 0x25b   :  { %834 = vmatpush3.bf16.msra.mxu0 %v885_v19 }
 0x25c   :  { %835 = vmatprep.subr.bf16.mxu0 %v900_v2 }
 0x25f   :  { %836 = vmatpush3.bf16.msra.mxu0 %v886_v20 }
 0x260   :  { %837 = vmatprep.subr.bf16.mxu0 %v900_v2 }
 0x263   :  { %838 = vmatpush3.bf16.msra.mxu0 %v887_v21 }
 0x264   :  { %839 = vmatprep.subr.bf16.mxu0 %v900_v2 }
 0x267   :  { %840 = vmatpush3.bf16.msra.mxu0 %v888_v22 }
 0x30a   :  { %v409_v7 = vpop.f32.mrf.mxu0 }
 0x30b   :  { %v410_v8 = vadd.f32 %v673_v6, %v409_v7 }
 0x30c   :  { %v803_v9 = vpop.f32.mrf.mxu0 }
 0x30d   :  { %v415_v10 = vmul.f32 0.5, %v410_v8 }
 0x30e   :  { %v412_v11 = vpop.f32.mrf.mxu0 }
 0x30f   :  { %895 = vtanh.f32 %v415_v10 }
 0x310   :  { %v804_v12 = vpop.f32.mrf.mxu0 }
 0x31c   :  { %v896_v13 = vpop.eup %895 }
 0x31d   :  { %v417_v14 = vmul.f32 0.5, %v896_v13 }
 0x31f   :  { %v418_v15 = vadd.f32 0.5, %v417_v14 }
 0x321   :  { %v419_v16 = vpack.c.bf16 %v418_v15, %v418_v15 }
 0x323   :  { %822 = vmatmul.mubr.bf16.vlgmr.msra.gmra.mxu1 %v419_v16 }
 0x3e3   :  { %v525_v24 = vpop.f32.mrf.mxu1 }
 0x3e4   :  { %v526_v25 = vadd.f32 %v682_v23, %v525_v24 }
 0x3e5   :  { %v823_v26 = vpop.f32.mrf.mxu1 }
 0x3e6   :  { %v531_v27 = vmul.f32 0.5, %v526_v25 }
 0x3e7   :  { %v528_v28 = vpop.f32.mrf.mxu1 }
 0x3e8   :  { %897 = vtanh.f32 %v531_v27 }
 0x3e9   :  { %v824_v29 = vpop.f32.mrf.mxu1 }
 0x3f5   :  { %v898_v30 = vpop.eup %897 }
 0x3f6   :  { %v533_v31 = vmul.f32 0.5, %v898_v30 }
 0x3f8   :  { %v534_v32 = vadd.f32 0.5, %v533_v31 }
 0x3fa   :  { %v535_v2 = vpack.c.bf16 %v534_v32, %v534_v32 }
 0x3fc   :  { %842 = vmatmul.mubr.bf16.vlgmr.msra.gmra.mxu0 %v535_v2 }
 0x4bc   :  { %v641_v34 = vpop.f32.mrf.mxu0 }
 0x4bd   :  { %v642_v35 = vadd.f32 %v691_v33, %v641_v34 }
 0x4be   :  { %v843_v36 = vpop.f32.mrf.mxu0 }
 0x4bf   :  { %648 = vst.msk [vmem:[%s1182_s13] sm:$0xff] %vm647_vm1, %v642_v35 }
 0x4c0   :  { %v644_v37 = vpop.f32.mrf.mxu0 }
 0x4c2   :  { %v844_v38 = vpop.f32.mrf.mxu0 }

</bundles_post_ra>
